<compile_context>
chip_gen: v5e
topology: v5e:2x2
jax: 0.10.0
libtpu: 0.0.40
codegen_flags: <defaults>
</compile_context>

<pallas_src>
import jax
import jax.numpy as jnp
from jax.experimental import pallas as pl
from jax.experimental.pallas import tpu as pltpu


def mlp_kernel(x_ref, w1_ref, b1_ref, w2_ref, b2_ref, o_ref):
    # In-kernel bf16 cast of the f32 x stream (hidden under DMA/MXU).
    x = x_ref[...].astype(w1_ref.dtype)
    # hidden: Linear(20, 256) + ReLU  (bf16 operands, f32 accumulation)
    h = jnp.dot(x, w1_ref[...], preferred_element_type=jnp.float32)
    h = jnp.maximum(h + b1_ref[...], 0.0)          # f32 elementwise (v5e-safe)
    # out: Linear(256, 10) -- narrow output, stored directly (masked vst is
    # cheap; the HBM writeback saving dominates on this mem-bound kernel).
    o = jnp.dot(h.astype(w2_ref.dtype), w2_ref[...],
                preferred_element_type=jnp.float32)
    o_ref[...] = (o + b2_ref[...]).astype(o_ref.dtype)


def mlp_forward(x, params, *, tb_max=4096, compute_dtype=jnp.bfloat16):
    w1, b1, w2, b2 = params
    B, D_in = x.shape
    D_h = w1.shape[1]
    D_out = w2.shape[1]

    # Batch tile: multiple of 8, capped at tb_max.  The batch remainder is
    # handled by Pallas partial-block masking -- no padded copy of x.
    TB = min(tb_max, max(8, ((B + 7) // 8) * 8))
    grid = (pl.cdiv(B, TB),)
    # NOTE(v7x): with large B this yields >= 2 grid steps so both TensorCores
    # get work; sweep tb_max in [4096, 8192] per generation if desired.

    # bf16 weight operands (native MXU path); biases + accumulation stay f32.
    w1c = w1.astype(compute_dtype)
    w2c = w2.astype(compute_dtype)
    b1f = b1.astype(jnp.float32)
    b2f = b2.astype(jnp.float32)

    wbytes = jnp.dtype(compute_dtype).itemsize
    cost = pl.CostEstimate(
        flops=2 * B * (D_in * D_h + D_h * D_out),
        bytes_accessed=(B * D_in * 4                         # f32 x stream
                        + B * D_out * 4                      # narrow f32 output
                        + (D_in * D_h + D_h * D_out) * wbytes  # bf16 weights
                        + (D_h + D_out) * 4),                 # f32 biases
        transcendentals=0,
    )

    return pl.pallas_call(
        mlp_kernel,
        out_shape=jax.ShapeDtypeStruct((B, D_out), jnp.float32),
        grid=grid,
        in_specs=[
            pl.BlockSpec((TB, D_in), lambda i: (i, 0)),    # x: batch-tiled
            pl.BlockSpec((D_in, D_h), lambda i: (0, 0)),   # w1: VMEM-resident
            pl.BlockSpec((1, D_h), lambda i: (0, 0)),      # b1: VMEM-resident
            pl.BlockSpec((D_h, D_out), lambda i: (0, 0)),  # w2: VMEM-resident
            pl.BlockSpec((1, D_out), lambda i: (0, 0)),    # b2: VMEM-resident
        ],
        out_specs=pl.BlockSpec((TB, D_out), lambda i: (i, 0)),
        compiler_params=pltpu.CompilerParams(
            dimension_semantics=("parallel",),
            vmem_limit_bytes=48 * 1024 * 1024,   # safe on v5e/v6e/v7x (64 MiB)
        ),
        cost_estimate=cost,
    )(x, w1c, b1f, w2c, b2f)


def init_params(key):
    """Deterministic synthetic init mimicking nn.Linear uniform(-1/sqrt(fan_in), +)."""
    dims = [(20, 256), (256, 10)]
    params = []
    for fan_in, fan_out in dims:
        key, kw, kb = jax.random.split(key, 3)
        bound = 1.0 / jnp.sqrt(fan_in)
        w = jax.random.uniform(kw, (fan_in, fan_out), jnp.float32, -bound, bound)
        b = jax.random.uniform(kb, (1, fan_out), jnp.float32, -bound, bound)
        params += [w, b]
    return params


def reference_forward(x, params, compute_dtype=jnp.bfloat16):
    """Pure-JAX reference using the same bf16-operand / f32-accum recipe."""
    w1, b1, w2, b2 = params
    h = jnp.dot(x.astype(compute_dtype), w1.astype(compute_dtype),
                preferred_element_type=jnp.float32)
    h = jnp.maximum(h + b1.astype(jnp.float32), 0.0)
    o = jnp.dot(h.astype(compute_dtype), w2.astype(compute_dtype),
                preferred_element_type=jnp.float32)
    return o + b2.astype(jnp.float32)


if __name__ == "__main__":
    key = jax.random.PRNGKey(0)
    key, kx = jax.random.split(key)
    # X = torch.rand(2, 20) -> uniform [0, 1)
    x = jax.random.uniform(kx, (2, 20), jnp.float32)
    params = init_params(key)

    out = mlp_forward(x, params)
    jax.block_until_ready(out)

    ref = reference_forward(x, params)
    assert out.shape == (2, 10), out.shape
    assert jnp.allclose(out, ref, atol=1e-3, rtol=1e-3), float(
        jnp.max(jnp.abs(out - ref)))
    print("KERNEL_OK")
</pallas_src>

<mosaic_0001>
module attributes {stable_mosaic.version = 11 : i64} {
  func.func @mlp_kernel(%arg0: i32, %arg1: memref<8x20xf32, #tpu.memory_space<vmem>>, %arg2: memref<20x256xbf16, #tpu.memory_space<vmem>>, %arg3: memref<1x256xf32, #tpu.memory_space<vmem>>, %arg4: memref<256x10xbf16, #tpu.memory_space<vmem>>, %arg5: memref<1x10xf32, #tpu.memory_space<vmem>>, %arg6: memref<8x10xf32, #tpu.memory_space<vmem>>) attributes {dimension_semantics = [#tpu.dimension_semantics<parallel>], iteration_bounds = array<i64: 1>, scalar_prefetch = 0 : i64, scratch_operands = 0 : i64, tpu.core_type = #tpu.core_type<tc>, window_params = [{transform_indices = @transform_0, window_bounds = array<i64: 8, 20>}, {pipeline_mode = #tpu.pipeline_mode<synchronous>, transform_indices = @transform_1, window_bounds = array<i64: 20, 256>}, {pipeline_mode = #tpu.pipeline_mode<synchronous>, transform_indices = @transform_2, window_bounds = array<i64: 1, 256>}, {pipeline_mode = #tpu.pipeline_mode<synchronous>, transform_indices = @transform_3, window_bounds = array<i64: 256, 10>}, {pipeline_mode = #tpu.pipeline_mode<synchronous>, transform_indices = @transform_4, window_bounds = array<i64: 1, 10>}, {transform_indices = @transform_5, window_bounds = array<i64: 8, 10>}]} {
    %c0 = arith.constant 0 : index
    %c0_0 = arith.constant 0 : index
    %0 = vector.load %arg1[%c0, %c0_0] : memref<8x20xf32, #tpu.memory_space<vmem>>, vector<8x20xf32>
    %1 = arith.truncf %0 : vector<8x20xf32> to vector<8x20xbf16>
    %c0_1 = arith.constant 0 : index
    %c0_2 = arith.constant 0 : index
    %2 = vector.load %arg2[%c0_1, %c0_2] : memref<20x256xbf16, #tpu.memory_space<vmem>>, vector<20x256xbf16>
    %cst = arith.constant dense<0.000000e+00> : vector<8x256xf32>
    %3 = tpu.matmul %1, %2, %cst {dimension_numbers = #tpu.dot_dimension_numbers<[1], [0], [0], [1], [0, 0, 1, 1], [], []>} : vector<8x20xbf16>, vector<20x256xbf16>, vector<8x256xf32> -> vector<8x256xf32>
    %c0_3 = arith.constant 0 : index
    %c0_4 = arith.constant 0 : index
    %4 = vector.load %arg3[%c0_3, %c0_4] : memref<1x256xf32, #tpu.memory_space<vmem>>, vector<1x256xf32>
    %5 = vector.broadcast %4 : vector<1x256xf32> to vector<8x256xf32>
    %6 = arith.addf %3, %5 : vector<8x256xf32>
    %cst_5 = arith.constant 0.000000e+00 : f32
    %7 = vector.broadcast %cst_5 : f32 to vector<8x256xf32>
    %8 = arith.maximumf %6, %7 : vector<8x256xf32>
    %9 = arith.truncf %8 : vector<8x256xf32> to vector<8x256xbf16>
    %c0_6 = arith.constant 0 : index
    %c0_7 = arith.constant 0 : index
    %10 = vector.load %arg4[%c0_6, %c0_7] : memref<256x10xbf16, #tpu.memory_space<vmem>>, vector<256x10xbf16>
    %cst_8 = arith.constant dense<0.000000e+00> : vector<8x10xf32>
    %11 = tpu.matmul %9, %10, %cst_8 {dimension_numbers = #tpu.dot_dimension_numbers<[1], [0], [0], [1], [0, 0, 1, 1], [], []>} : vector<8x256xbf16>, vector<256x10xbf16>, vector<8x10xf32> -> vector<8x10xf32>
    %c0_9 = arith.constant 0 : index
    %c0_10 = arith.constant 0 : index
    %12 = vector.load %arg5[%c0_9, %c0_10] : memref<1x10xf32, #tpu.memory_space<vmem>>, vector<1x10xf32>
    %13 = vector.broadcast %12 : vector<1x10xf32> to vector<8x10xf32>
    %14 = arith.addf %11, %13 : vector<8x10xf32>
    %c0_11 = arith.constant 0 : index
    %c0_12 = arith.constant 0 : index
    %15 = vector.load %arg6[%c0_11, %c0_12] : memref<8x10xf32, #tpu.memory_space<vmem>>, vector<8x10xf32>
    tpu.vector_store %arg6[%c0_11, %c0_12], %14 {strides = array<i32>} : memref<8x10xf32, #tpu.memory_space<vmem>>, vector<8x10xf32>,
    return
  }
  func.func @transform_0(%arg0: i32) -> (i32, i32) {
    %c0_i32 = arith.constant 0 : i32
    %c0_i32_0 = arith.constant 0 : i32
    return %arg0, %c0_i32 : i32, i32
  }
  func.func @transform_1(%arg0: i32) -> (i32, i32) {
    %c0_i32 = arith.constant 0 : i32
    %c0_i32_0 = arith.constant 0 : i32
    %c0_i32_1 = arith.constant 0 : i32
    return %c0_i32, %c0_i32_0 : i32, i32
  }
  func.func @transform_2(%arg0: i32) -> (i32, i32) {
    %c0_i32 = arith.constant 0 : i32
    %c0_i32_0 = arith.constant 0 : i32
    %c0_i32_1 = arith.constant 0 : i32
    return %c0_i32, %c0_i32_0 : i32, i32
  }
  func.func @transform_3(%arg0: i32) -> (i32, i32) {
    %c0_i32 = arith.constant 0 : i32
    %c0_i32_0 = arith.constant 0 : i32
    %c0_i32_1 = arith.constant 0 : i32
    return %c0_i32, %c0_i32_0 : i32, i32
  }
  func.func @transform_4(%arg0: i32) -> (i32, i32) {
    %c0_i32 = arith.constant 0 : i32
    %c0_i32_0 = arith.constant 0 : i32
    %c0_i32_1 = arith.constant 0 : i32
    return %c0_i32, %c0_i32_0 : i32, i32
  }
  func.func @transform_5(%arg0: i32) -> (i32, i32) {
    %c0_i32 = arith.constant 0 : i32
    %c0_i32_0 = arith.constant 0 : i32
    return %arg0, %c0_i32 : i32, i32
  }
}

</mosaic_0001>

<bundles_post_ra>
// kernel: tpu_custom_call.1
= control target key start
LH: loop header
LB: loop body
LE: loop exit
PB: predicated region body
PF: predicated region fallthrough
CT: control target
= control target key end

     0   :  { %10 = vsyncpa [#allocation3], 0  ;;  %vm52_vm0 = vcmask 1041408   ;;  %vm48_vm1 = vcmask 162816   ;;  %vm247_vm2 = vcmask 80896   ;;  %s497_s0 = inlined_call_operand.vmem [shape: f32[2,20], index: 0, kind: input, shape index: {}]   ;;  %s498_s1 = inlined_call_operand.vmem [shape: bf16[20,256], index: 1, kind: input, shape index: {}]   ;;  %s499_s2 = inlined_call_operand.vmem [shape: f32[1,256], index: 2, kind: input, shape index: {}]   ;;  %s500_s3 = inlined_call_operand.vmem [shape: bf16[256,10], index: 3, kind: input, shape index: {}]   ;;  %s501_s4 = inlined_call_operand.vmem [shape: f32[1,10], index: 4, kind: input, shape index: {}]   ;;  %s502_s5 = inlined_call_operand.hbm [shape: f32[2,10], index: 5, kind: output, shape index: {}]  }
   0x1   :  { %v26_v0 = vld [vmem:[%s498_s1 + $0x10] sm:$0x33]  ;;  %v269_v3 = vld [vmem:[%s498_s1] sm:$0xf]  ;;  %v350_v4 = vld [vmem:[%s500_s3 + $0x38] sm:$0xff] }
   0x2   :  { %v40_v1 = vunpack.c.l.b16 %v26_v0  ;;  %v41_v2 = vunpack.c.h.b16 %v26_v0  ;;  %v358_v5 = vld [vmem:[%s500_s3 + $0x78] sm:$0xff]  ;;  %v342_v8 = vld [vmem:[%s498_s1 + $0x4] sm:$0xf0]  ;;  %v341_v9 = vld [vmem:[%s498_s1 + $0x4] sm:$0xf]  ;;  %221 = vmatpush.bf16.msra.mxu2 %v350_v4 }
   0x3   :  { %v271_v10 = vld [vmem:[%s498_s1 + $0x8] sm:$0xf0]  ;;  %234 = vmatpush.bf16.msra.mxu3 %v358_v5  ;;  %v349_v11 = vld [vmem:[%s500_s3 + $0x30] sm:$0xff]  ;;  %v270_v15 = vor.u32 %v342_v8, %v269_v3  ;;  %v22_v17 = vld [vmem:[%s497_s0] sm:$0xff] }
   0x4   :  { %v44_v6 = vpack.c.b16 %v40_v1, %v40_v1  ;;  %v45_v7 = vpack.c.b16 %v41_v2, %v41_v2  ;;  %v357_v12 = vld [vmem:[%s500_s3 + $0x70] sm:$0xff]  ;;  %v274_v16 = vor.u32 %v341_v9, %v271_v10  ;;  %v348_v18 = vld [vmem:[%s500_s3 + $0x28] sm:$0xff]  ;;  %v23_v20 = vpack.c.bf16 %v22_v17, %v22_v17  ;;  %v347_v21 = vld [vmem:[%s500_s3 + $0x20] sm:$0xff] }
   0x5   :  { %v356_v19 = vld [vmem:[%s500_s3 + $0x68] sm:$0xff]  ;;  %v355_v22 = vld [vmem:[%s500_s3 + $0x60] sm:$0xff]  ;;  %v346_v23 = vld [vmem:[%s500_s3 + $0x18] sm:$0xff] }
   0x6   :  { %v54_v13 = vsel %vm52_vm0, %v44_v6, 0  ;;  %v57_v14 = vsel %vm52_vm0, %v45_v7, 0  ;;  %222 = vmatpush.bf16.msra.mxu2 %v349_v11  ;;  %v354_v24 = vld [vmem:[%s500_s3 + $0x58] sm:$0xff]  ;;  %v345_v25 = vld [vmem:[%s500_s3 + $0x10] sm:$0xff]  ;;  %v344_v27 = vld [vmem:[%s500_s3 + $0x8] sm:$0xff] }
   0x7   :  { %65 = vmatpush.bf16.msra.mxu0 %v54_v13  ;;  %78 = vmatpush.bf16.msra.mxu1 %v57_v14  ;;  %v353_v26 = vld [vmem:[%s500_s3 + $0x50] sm:$0xff]  ;;  %v352_v28 = vld [vmem:[%s500_s3 + $0x48] sm:$0xff]  ;;  %v343_v29 = vld [vmem:[%s500_s3] sm:$0xff] }
   0x8   :  { %235 = vmatpush.bf16.msra.mxu3 %v357_v12  ;;  %v351_v30 = vld [vmem:[%s500_s3 + $0x40] sm:$0xff] }
   0x9   :  { %v27_v31 = vld [vmem:[%s499_s2] sm:$0x3] }
   0xa   :  { %223 = vmatpush.bf16.msra.mxu2 %v348_v18  ;;  %v29_v32 = vperm.slane %v27_v31, 0  ;;  %v30_v33 = vperm.slane %v27_v31, 1  ;;  %v362_v44 = vld [vmem:[%s501_s4] ss:$0 sm:$0xff] }
   0xb   :  { %66 = vmatpush.bf16.msra.mxu0 %v270_v15  ;;  %79 = vmatpush.bf16.msra.mxu1 %v274_v16 }
   0xc   :  { %236 = vmatpush.bf16.msra.mxu3 %v356_v19 }
   0xe   :  { %275 = vmatmul.msk.bf16.vlgmr.msra.gmra.mxu0 %vm48_vm1, %v23_v20  ;;  %276 = vmatmul.msk.bf16.vlgmr.msra.gmra.mxu1 %vm48_vm1, %v23_v20 }
   0xf   :  { %224 = vmatpush.bf16.msra.mxu2 %v347_v21 }
  0x10   :  { %237 = vmatpush.bf16.msra.mxu3 %v355_v22 }
  0x13   :  { %225 = vmatpush.bf16.msra.mxu2 %v346_v23 }
  0x14   :  { %238 = vmatpush.bf16.msra.mxu3 %v354_v24 }
  0x17   :  { %226 = vmatpush.bf16.msra.mxu2 %v345_v25 }
  0x18   :  { %239 = vmatpush.bf16.msra.mxu3 %v353_v26 }
  0x1b   :  { %227 = vmatpush.bf16.msra.mxu2 %v344_v27 }
  0x1c   :  { %240 = vmatpush.bf16.msra.mxu3 %v352_v28 }
  0x1f   :  { %228 = vmatpush.bf16.msra.mxu2 %v343_v29 }
  0x20   :  { %241 = vmatpush.bf16.msra.mxu3 %v351_v30 }
  0x8b   :  { %v68_v34 = vpop.f32.mrf.mxu0  ;;  %v81_v35 = vpop.f32.mrf.mxu1 }
  0x8c   :  { %v69_v36 = vadd.f32 %v68_v34, %v29_v32  ;;  %v82_v37 = vadd.f32 %v81_v35, %v30_v33 }
  0x8e   :  { %v85_v38 = vmax.f32 %v69_v36, 0.0  ;;  %v86_v39 = vmax.f32 %v82_v37, 0.0 }
  0x90   :  { %v87_v40 = vpack.c.bf16 %v85_v38, %v85_v38  ;;  %v88_v41 = vpack.c.bf16 %v86_v39, %v86_v39 }
  0x92   :  { %229 = vmatmul.bf16.vlgmr.msra.gmra.mxu2 %v87_v40  ;;  %242 = vmatmul.bf16.vlgmr.msra.gmra.mxu3 %v88_v41 }
  0x93   :  { %v70_v42 = vpop.f32.mrf.mxu0  ;;  %v83_v43 = vpop.f32.mrf.mxu1 }
 0x115   :  { %v230_v45 = vpop.f32.mrf.mxu2  ;;  %v243_v46 = vpop.f32.mrf.mxu3 }
 0x116   :  { %v231_v47 = vadd.f32 %v362_v44, %v230_v45 }
 0x118   :  { %v244_v48 = vadd.f32 %v243_v46, %v231_v47 }
 0x11a   :  { %248 = vst.msk [vmem:[#allocation2] sm:$0xff] %vm247_vm2, %v244_v48 }
 0x11d   :  { %v232_v49 = vpop.f32.mrf.mxu2  ;;  %v245_v50 = vpop.f32.mrf.mxu3 }
 0x11e   :  { %252 = vsyncadd [#allocation3], 96  ;;  %s255_s13 = sshll.u32 %s502_s5, 4  ;;  %s389_s14 = smov [#allocation2]   ;;  %s256_s13 = int_to_ptr.hbm [resolvable:$true] %s255_s13 }
 0x11f   :  { %s253_s15 = sshll.u32 %s389_s14, 4  ;;  %s390_s16 = smov 32   ;;  %s254_s15 = int_to_ptr.vmem [resolvable:$true] %s253_s15 }
 0x120   :  { %s391_s17 = smov 2  }
 0x121   :  { %261 = dma.vmem_to_hbm [thread:$0]  %s254_s15, 32, %s256_s13, [#allocation3], %s390_s16, %s390_s16, %s391_s17  }
 0x122   :  { %387 = dma.done.wait [#allocation3], 128  }
 0x123   :  { %388 = vsyncadd [#allocation3], 4294967168 }
 0x124   :  { %266 = vsyncpa [#allocation3], 1 }

</bundles_post_ra>
